<compile_context>
chip_gen: v6e
topology: v6e:2x2x1
jax: 0.10.0
libtpu: 0.0.40
codegen_flags: <defaults>
</compile_context>

<pallas_src>
import math
import functools

import jax
import jax.numpy as jnp
from jax.experimental import pallas as pl
from jax.experimental.pallas import tpu as pltpu


def _npc_kernel(scale_ref, x_ref, mem_ref, o_ref):
    """One grid step: o = (x @ mem_tile.T) * (1/T).

    scale_ref: SMEM (1,) float32, precomputed 1/T
    x_ref:     VMEM (Mp, Kp)  whole batch, whole contraction dim (resident)
    mem_ref:   VMEM (tn, Kp)  memory tile, row-major (PyTorch layout)
    o_ref:     VMEM (Mp, tn)  output tile, float32
    """
    logits = jax.lax.dot_general(
        x_ref[...],
        mem_ref[...],
        dimension_numbers=(((1,), (1,)), ((), ())),   # contract K on both; NT, no transpose
        preferred_element_type=jnp.float32,           # f32 accumulation on the MXU
    )
    o_ref[...] = (logits * scale_ref[0]).astype(o_ref.dtype)


def _prepare_memory(memory, compute_dtype):
    """One-time cast to the streaming dtype + zero-pad K to a lane multiple."""
    N, K = memory.shape
    Kp = pl.cdiv(K, 128) * 128
    mem = memory.astype(compute_dtype)
    if Kp != K:
        mem = jnp.zeros((N, Kp), compute_dtype).at[:, :K].set(mem)
    return mem


def _select_tn(N, Kp, Mp, mem_itemsize, *, vmem_budget_bytes=24 * 1024 * 1024,
               max_tn=32768, granule=512):
    """Pick the N tile size from a VMEM budget (double-buffered mem + out tiles)."""
    per_row = 2 * Kp * mem_itemsize + 2 * Mp * 4   # bank tile (x2 bufs) + f32 out tile (x2)
    tn = int(vmem_budget_bytes // per_row)
    tn = min(tn, max_tn)
    tn = max(granule, (tn // granule) * granule)
    # Don't exceed the bank size (round N DOWN to a 128 multiple so a single
    # block is never larger than the array; the trailing ragged block is masked).
    n_floor = max(128, (N // 128) * 128)
    tn = min(tn, n_floor)
    # Keep >=4 grid steps for sizeable banks so v7x's 2 TensorCores both get
    # work under dimension_semantics=("parallel",).
    while pl.cdiv(N, tn) < 4 and tn >= 2048:
        tn = max(1024, ((tn // 2) // 128) * 128)
    return tn


@functools.partial(jax.jit, static_argnames=("compute_dtype",))
def non_parametric_classifier_forward(x, memory, scale, *, compute_dtype=jnp.bfloat16):
    """out = (x @ memory[:, :K].T) * scale  via a 1-D-grid Pallas TPU kernel.

    x:      (M, K) any float dtype
    memory: (N, K) or already-prepared (N, Kp) in `compute_dtype` (no copy then)
    scale:  scalar float32, equal to 1/T
    """
    M, K = x.shape
    N, Km = memory.shape

    # Fallback per-call prep (no-op when the bank was prepared at init).
    if memory.dtype != jnp.dtype(compute_dtype) or Km % 128 != 0:
        memory = _prepare_memory(memory, compute_dtype)
    Kp = memory.shape[1]
    assert K <= Kp, "inputSize mismatch between x and memory"

    Mp = pl.cdiv(M, 8) * 8
    itemsize = jnp.dtype(compute_dtype).itemsize
    tn = _select_tn(N, Kp, Mp, itemsize)
    grid = (pl.cdiv(N, tn),)

    # x is tiny (batch x K): per-call cast/pad is negligible.
    x_p = x.astype(compute_dtype)
    if (Mp, Kp) != (M, K):
        x_p = jnp.zeros((Mp, Kp), compute_dtype).at[:M, :K].set(x_p)

    scale = jnp.asarray(scale, dtype=jnp.float32).reshape((1,))

    out = pl.pallas_call(
        _npc_kernel,
        out_shape=jax.ShapeDtypeStruct((Mp, N), jnp.float32),
        grid_spec=pltpu.PrefetchScalarGridSpec(
            num_scalar_prefetch=0,
            grid=grid,
            in_specs=[
                # 1/T lives in SMEM, read as a scalar.
                pl.BlockSpec(memory_space=pltpu.MemorySpace.SMEM),
                # Whole x stays resident (block index never changes -> DMA'd once).
                pl.BlockSpec((Mp, Kp), lambda j: (0, 0)),
                # Memory bank streamed in large row-major (tn, Kp) tiles.
                pl.BlockSpec((tn, Kp), lambda j: (j, 0)),
            ],
            out_specs=pl.BlockSpec((Mp, tn), lambda j: (0, j)),
        ),
        compiler_params=pltpu.CompilerParams(
            dimension_semantics=("parallel",),
            # Explicit scoped-VMEM limit: raises v5e's 16 MiB default, matches
            # v6e/v7x defaults, well under v7x's 64 MiB physical VMEM.
            vmem_limit_bytes=32 * 1024 * 1024,
        ),
        cost_estimate=pl.CostEstimate(
            flops=2 * Mp * N * Kp,
            transcendentals=0,
            bytes_accessed=N * Kp * itemsize + Mp * N * 4 + Mp * Kp * itemsize,
        ),
    )(scale, x_p, memory)

    # Only the (tiny) batch-row padding ever gets sliced; N is emitted exactly.
    return out if Mp == M else out[:M]


class NonParametricClassifier:
    """JAX/Pallas port of the PyTorch NonParametricClassifier forward pass."""

    def __init__(self, inputSize, outputSize, T, momentum, key,
                 compute_dtype=jnp.bfloat16):
        self.nLem = outputSize
        self.inputSize = inputSize
        self.compute_dtype = compute_dtype
        self.params = jnp.array([T, momentum], dtype=jnp.float32)
        # memory init: uniform(0,1) * 2*stdv - stdv, stdv = 1/sqrt(inputSize/3)
        stdv = 1.0 / math.sqrt(inputSize / 3)
        u = jax.random.uniform(key, (outputSize, inputSize), dtype=jnp.float32)
        mem_f32 = u * (2.0 * stdv) - stdv
        # Hoisted one-time cast to the streaming dtype + K padding: the forward
        # pass never copies the bank again (it is HBM-bandwidth bound).
        self.memory = _prepare_memory(mem_f32, compute_dtype)

    def forward(self, x, y):
        # y (instance indices) only matters for the backward/memory momentum update.
        # TODO(synk): memory momentum update (index_copy_) happens in backward; not implemented here.
        scale = 1.0 / self.params[0]
        return non_parametric_classifier_forward(
            x, self.memory, scale, compute_dtype=self.compute_dtype
        )

    def just_calculate(self, x):
        scale = 1.0 / self.params[0]
        return non_parametric_classifier_forward(
            x, self.memory, scale, compute_dtype=self.compute_dtype
        )


if __name__ == "__main__":
    # Small shapes consistent with the module: batch=8, inputSize=128, outputSize=256.
    batch, inputSize, outputSize = 8, 128, 256
    T, momentum = 0.05, 0.5

    key = jax.random.PRNGKey(0)
    k_mem, k_x, k_mem2, k_x2 = jax.random.split(key, 4)

    npc = NonParametricClassifier(inputSize, outputSize, T, momentum, k_mem)
    x = jax.random.normal(k_x, (batch, inputSize), dtype=jnp.float32)
    y = jnp.arange(batch, dtype=jnp.int32)   # instance labels (unused in forward compute)

    out = jax.block_until_ready(npc.forward(x, y))

    # Plain-JAX reference on the same bf16-rounded operands, f32 accumulation.
    xc = x.astype(npc.compute_dtype).astype(jnp.float32)
    memc = npc.memory[:, :inputSize].astype(jnp.float32)
    ref = jnp.dot(xc, memc.T, precision=jax.lax.Precision.HIGHEST) / T
    assert out.shape == (batch, outputSize)
    assert out.dtype == jnp.float32
    assert jnp.allclose(out, ref, rtol=1e-4, atol=1e-2), "mismatch vs reference"

    # Ragged shapes: exercises the one-time K padding and the masked trailing
    # N block (no per-call bank copy, no output slice in N).
    b2, k2, n2, T2 = 5, 100, 300, 0.07
    npc2 = NonParametricClassifier(k2, n2, T2, momentum, k_mem2)
    x2 = jax.random.normal(k_x2, (b2, k2), dtype=jnp.float32)
    out2 = jax.block_until_ready(npc2.forward(x2, jnp.arange(b2, dtype=jnp.int32)))

    x2c = x2.astype(npc2.compute_dtype).astype(jnp.float32)
    mem2c = npc2.memory[:, :k2].astype(jnp.float32)
    ref2 = jnp.dot(x2c, mem2c.T, precision=jax.lax.Precision.HIGHEST) / T2
    assert out2.shape == (b2, n2)
    assert out2.dtype == jnp.float32
    assert jnp.allclose(out2, ref2, rtol=1e-4, atol=1e-2), "mismatch vs reference (ragged)"

    print("KERNEL_OK")
</pallas_src>

<mosaic_0001>
module attributes {stable_mosaic.version = 11 : i64} {
  func.func @_npc_kernel(%arg0: i32, %arg1: memref<1xf32, #tpu.memory_space<smem>>, %arg2: memref<8x128xbf16, #tpu.memory_space<vmem>>, %arg3: memref<256x128xbf16, #tpu.memory_space<vmem>>, %arg4: memref<8x256xf32, #tpu.memory_space<vmem>>) attributes {dimension_semantics = [#tpu.dimension_semantics<parallel>], iteration_bounds = array<i64: 1>, scalar_prefetch = 0 : i64, scratch_operands = 0 : i64, tpu.core_type = #tpu.core_type<tc>, window_params = [{transform_indices = @transform_0, window_bounds = array<i64: 1>}, {pipeline_mode = #tpu.pipeline_mode<synchronous>, transform_indices = @transform_1, window_bounds = array<i64: 8, 128>}, {transform_indices = @transform_2, window_bounds = array<i64: 256, 128>}, {transform_indices = @transform_3, window_bounds = array<i64: 8, 256>}]} {
    %c0 = arith.constant 0 : index
    %c0_0 = arith.constant 0 : index
    %0 = vector.load %arg2[%c0, %c0_0] : memref<8x128xbf16, #tpu.memory_space<vmem>>, vector<8x128xbf16>
    %c0_1 = arith.constant 0 : index
    %c0_2 = arith.constant 0 : index
    %1 = vector.load %arg3[%c0_1, %c0_2] : memref<256x128xbf16, #tpu.memory_space<vmem>>, vector<256x128xbf16>
    %cst = arith.constant dense<0.000000e+00> : vector<8x256xf32>
    %2 = tpu.matmul %0, %1, %cst {dimension_numbers = #tpu.dot_dimension_numbers<[1], [1], [0], [0], [0, 0, 1, 0], [], []>} : vector<8x128xbf16>, vector<256x128xbf16>, vector<8x256xf32> -> vector<8x256xf32>
    %c0_3 = arith.constant 0 : index
    %3 = memref.load %arg1[%c0_3] : memref<1xf32, #tpu.memory_space<smem>>
    %4 = vector.broadcast %3 : f32 to vector<8x256xf32>
    %5 = arith.mulf %2, %4 : vector<8x256xf32>
    %c0_4 = arith.constant 0 : index
    %c0_5 = arith.constant 0 : index
    %6 = vector.load %arg4[%c0_4, %c0_5] : memref<8x256xf32, #tpu.memory_space<vmem>>, vector<8x256xf32>
    tpu.vector_store %arg4[%c0_4, %c0_5], %5 {strides = array<i32>} : memref<8x256xf32, #tpu.memory_space<vmem>>, vector<8x256xf32>,
    return
  }
  func.func @transform_0(%arg0: i32) -> i32 {
    %c0_i32 = arith.constant 0 : i32
    %c0_i32_0 = arith.constant 0 : i32
    return %c0_i32 : i32
  }
  func.func @transform_1(%arg0: i32) -> (i32, i32) {
    %c0_i32 = arith.constant 0 : i32
    %c0_i32_0 = arith.constant 0 : i32
    %c0_i32_1 = arith.constant 0 : i32
    return %c0_i32, %c0_i32_0 : i32, i32
  }
  func.func @transform_2(%arg0: i32) -> (i32, i32) {
    %c0_i32 = arith.constant 0 : i32
    %c0_i32_0 = arith.constant 0 : i32
    return %arg0, %c0_i32 : i32, i32
  }
  func.func @transform_3(%arg0: i32) -> (i32, i32) {
    %c0_i32 = arith.constant 0 : i32
    %c0_i32_0 = arith.constant 0 : i32
    return %c0_i32, %arg0 : i32, i32
  }
}

</mosaic_0001>

<bundles_post_ra>
// kernel: non_parametric_classifier_forward.1
= control target key start
LH: loop header
LB: loop body
LE: loop exit
PB: predicated region body
PF: predicated region fallthrough
CT: control target
= control target key end

     0   :  { %9 = vsyncpa [#allocation4], 0  ;;  %s356_s0 = inlined_call_operand.<no memory space> [shape: f32[1], index: 0, kind: input, shape index: {}]   ;;  %s357_s1 = inlined_call_operand.vmem [shape: bf16[8,128], index: 1, kind: input, shape index: {}]   ;;  %s358_s2 = inlined_call_operand.hbm [shape: bf16[256,128], index: 2, kind: input, shape index: {}]   ;;  %s359_s3 = inlined_call_operand.hbm [shape: f32[8,256], index: 3, kind: output, shape index: {}]  }
   0x1   :  { %10 = vsyncpa [#allocation5], 0  ;;  %s320_s12 = smov [#allocation3]  }
   0x2   :  { %s20_s13 = sshll.u32 %s320_s12, 4  ;;  %s21_s13 = int_to_ptr.vmem [resolvable:$true] %s20_s13 }
   0x3   :  { %s284_s14 = scalar_lea.vmem %s21_s13, 2048  ;;  %p289_p1 = scmp.lt.s32.totalorder %s21_s13, %s21_s13 }
   0x4   :  { %p285_p0 = scmp.ne.s32.totalorder %s21_s13, %s284_s14  ;;  %p290_p2 = scmp.lt.s32.totalorder %s284_s14, %s284_s14 }
   0x6   :  { %p291_p3 = por %p290_p2, %p289_p1 }
   0x8   :  { %p292_p4 = pnand %p291_p3, %p285_p0 }
   0xa   :  { %295 = shalt.err (!%p292_p4)
}
   0xb   :  { %s321_s15 = smov 64   ;;  %s322_s16 = smov 4  }
   0xc   :  { %26 = dma.hbm_to_vmem [thread:$0]  %s358_s2, 2048, %s21_s13, [#allocation4], %s321_s15, %s321_s15, %s322_s16  }
   0xd   :  { %316 = dma.done.wait [#allocation4], 2048  }
   0xe   :  { %317 = vsyncadd [#allocation4], 4294965248  ;;  %v260_v0 = vld [vmem:[#allocation3 + $0x78] sm:$0xff]   ;;  %v262_v2 = vld [vmem:[#allocation3 + $0x70] sm:$0xff]   ;;  %v202_v17 = vstv %s356_s0  ;;  %s323_s21 = smov [#allocation6]  }
   0xf   :  { %v261_v1 = vld [vmem:[#allocation3 + $0x38] sm:$0xff]   ;;  %238 = vmatprep.subr.bf16.mxu0 %v260_v0  ;;  %v263_v3 = vld [vmem:[#allocation3 + $0x30] sm:$0xff]   ;;  %v264_v4 = vld [vmem:[#allocation3 + $0x68] sm:$0xff]   ;;  %s213_s22 = sshll.u32 %s323_s21, 4  ;;  %s214_s22 = int_to_ptr.vmem [resolvable:$true] %s213_s22 }
  0x10   :  { %239 = vmatpush3.bf16.xpose.msra.mxu0 %v261_v1  ;;  %v265_v5 = vld [vmem:[#allocation3 + $0x28] sm:$0xff]   ;;  %v266_v6 = vld [vmem:[#allocation3 + $0x60] sm:$0xff]   ;;  %v268_v9 = vld [vmem:[#allocation3 + $0x58] sm:$0xff]   ;;  %s296_s23 = scalar_lea.vmem %s214_s22, 256  ;;  %p301_p6 = scmp.lt.s32.totalorder %s214_s22, %s214_s22 }
  0x11   :  { %240 = vmatprep.subr.bf16.mxu0 %v262_v2  ;;  %v31_v7 = vld [vmem:[%s357_s1] sm:$0xf]  ;;  %v269_v10 = vld [vmem:[#allocation3 + $0x18] sm:$0xff]   ;;  %v270_v11 = vld [vmem:[#allocation3 + $0x50] sm:$0xff]   ;;  %p297_p5 = scmp.ne.s32.totalorder %s214_s22, %s296_s23  ;;  %p302_p7 = scmp.lt.s32.totalorder %s296_s23, %s296_s23 }
  0x12   :  { %254 = vmatprep.mubr.bf16.mxu0 %v31_v7  ;;  %v267_v8 = vld [vmem:[#allocation3 + $0x20] sm:$0xff]   ;;  %v271_v12 = vld [vmem:[#allocation3 + $0x10] sm:$0xff]   ;;  %v272_v13 = vld [vmem:[#allocation3 + $0x48] sm:$0xff]  }
  0x13   :  { %v273_v14 = vld [vmem:[#allocation3 + $0x8] sm:$0xff]   ;;  %v274_v15 = vld [vmem:[#allocation3 + $0x40] sm:$0xff]   ;;  %p303_p8 = por %p302_p7, %p301_p6 }
  0x14   :  { %v275_v16 = vld [vmem:[#allocation3] sm:$0xff]  }
  0x15   :  { %p304_p9 = pnand %p303_p8, %p297_p5 }
  0x18   :  { %241 = vmatpush3.bf16.xpose.msra.mxu0 %v263_v3 }
  0x19   :  { %242 = vmatprep.subr.bf16.mxu0 %v264_v4 }
  0x20   :  { %243 = vmatpush3.bf16.xpose.msra.mxu0 %v265_v5 }
  0x21   :  { %244 = vmatprep.subr.bf16.mxu0 %v266_v6 }
  0x28   :  { %245 = vmatpush3.bf16.xpose.msra.mxu0 %v267_v8 }
  0x29   :  { %246 = vmatprep.subr.bf16.mxu0 %v268_v9 }
  0x30   :  { %247 = vmatpush3.bf16.xpose.msra.mxu0 %v269_v10 }
  0x31   :  { %248 = vmatprep.subr.bf16.mxu0 %v270_v11 }
  0x38   :  { %249 = vmatpush3.bf16.xpose.msra.mxu0 %v271_v12 }
  0x39   :  { %250 = vmatprep.subr.bf16.mxu0 %v272_v13 }
  0x40   :  { %251 = vmatpush3.bf16.xpose.msra.mxu0 %v273_v14 }
  0x41   :  { %252 = vmatprep.subr.bf16.mxu0 %v274_v15 }
  0x48   :  { %253 = vmatpush3.bf16.xpose.msra.mxu0 %v275_v16 }
  0x4f   :  { %255 = vmatmul.mubr.bf16.vlgmr.msra.gmra.mxu0 %v31_v7 }
 0x10f   :  { %v194_v18 = vpop.f32.mrf.mxu0 }
 0x110   :  { %v203_v19 = vmul.f32 %v202_v17, %v194_v18 }
 0x111   :  { %v196_v20 = vpop.f32.mrf.mxu0 }
 0x112   :  { %205 = vst [vmem:[#allocation6] sm:$0xff] %v203_v19  ;;  %v204_v21 = vmul.f32 %v202_v17, %v196_v20 }
 0x113   :  { %v198_v22 = vpop.f32.mrf.mxu0 }
 0x114   :  { %206 = vst [vmem:[#allocation6 + $0x8] sm:$0xff] %v204_v21 }
 0x115   :  { %v199_v23 = vpop.f32.mrf.mxu0 }
 0x116   :  { %307 = shalt.err (!%p304_p9)
}
 0x117   :  { %216 = dma.vmem_to_hbm [thread:$0]  %s214_s22, 256, %s359_s3, [#allocation5]  }
 0x118   :  { %318 = dma.done.wait [#allocation5], 256  }
 0x119   :  { %319 = vsyncadd [#allocation5], 4294967040 }
 0x11a   :  { %220 = vsyncpa [#allocation4], 1 }
 0x11b   :  { %221 = vsyncpa [#allocation5], 1 }

</bundles_post_ra>
